<compile_context>
chip_gen: v5e
topology: v5e:2x2
jax: 0.10.0
libtpu: 0.0.40
codegen_flags: <defaults>
</compile_context>

<pallas_src>
import jax
import jax.numpy as jnp
from jax.experimental import pallas as pl
from jax.experimental.pallas import tpu as pltpu


_LANE = 128                         # TPU vreg lane width
_MAX_LANES = 512                    # target lane-dense slab width (multiple of 128)
_TARGET_BLOCK_BYTES = 2 * 1024 * 1024   # 2 MiB/block -> 4x (in+out double buffer)
                                        # = 8 MiB, fits every chip's default
                                        # scoped VMEM (v5e 16 MiB, v6e/v7x 32 MiB)


def _encoder_interface_kernel(x_ref, o_ref):
    # Identity pass-through of the encoder input block (VMEM -> VMEM).
    # A concrete Encoder subclass would put its real compute here.
    o_ref[...] = x_ref[...]


def _choose_layout(n_elems: int, itemsize: int):
    """Pick a lane-dense [rows, lanes] view and a sublane-aligned row block."""
    # Pad the flat element count up to a multiple of the lane width.
    n_pad = ((n_elems + _LANE - 1) // _LANE) * _LANE
    # Largest lane width (multiple of 128, capped) that divides n_pad.
    lanes = _LANE
    for cand in (_MAX_LANES, _MAX_LANES // 2, _LANE):
        if n_pad % cand == 0:
            lanes = cand
            break
    rows = n_pad // lanes
    # Row block sized so double-buffered in+out stays under the smallest
    # default scoped-VMEM budget.
    block_rows = max(8, _TARGET_BLOCK_BYTES // (lanes * itemsize))
    if rows <= block_rows:
        block_rows = rows                     # full extent: always legal
    else:
        block_rows = (block_rows // 8) * 8    # keep (8, 128) tiling alignment
    return n_pad, rows, lanes, block_rows


def encoder_forward(x: jax.Array) -> jax.Array:
    """Pallas implementation of the (abstract) Encoder.forward data path.

    The interface defines no transformation, so this is an identity move of X
    through VMEM, laid out lane-dense and tiled large so the copy runs near
    the HBM roofline. Returns an array identical to x (same shape/dtype).
    """
    orig_shape = x.shape
    orig_dtype = x.dtype
    n = x.size
    itemsize = jnp.dtype(orig_dtype).itemsize

    n_pad, rows, lanes, block_rows = _choose_layout(n, itemsize)

    # Wrapper-side layout plumbing (not compute): present a lane-dense slab.
    x_flat = x.reshape(-1)
    if n_pad != n:
        x_flat = jnp.pad(x_flat, (0, n_pad - n))
    x2d = x_flat.reshape(rows, lanes)

    grid = (pl.cdiv(rows, block_rows),)

    out2d = pl.pallas_call(
        _encoder_interface_kernel,
        out_shape=jax.ShapeDtypeStruct((rows, lanes), orig_dtype),
        grid_spec=pltpu.PrefetchScalarGridSpec(
            num_scalar_prefetch=0,
            grid=grid,
            in_specs=[pl.BlockSpec((block_rows, lanes), lambda r: (r, 0))],
            out_specs=pl.BlockSpec((block_rows, lanes), lambda r: (r, 0)),
        ),
        compiler_params=pltpu.CompilerParams(
            dimension_semantics=("parallel",),
        ),
        # Identity op: reuse the (reshaped) input buffer for the output.
        input_output_aliases={0: 0},
        # Pure memory traffic: read + write of the whole slab, zero flops.
        cost_estimate=pl.CostEstimate(
            flops=0,
            transcendentals=0,
            bytes_accessed=2 * rows * lanes * itemsize,
        ),
    )(x2d)

    out_flat = out2d.reshape(-1)
    if n_pad != n:
        out_flat = out_flat[:n]
    return out_flat.reshape(orig_shape)


if __name__ == "__main__":
    key = jax.random.PRNGKey(0)
    batch, seq, hidden = 2, 8, 32
    x = jax.random.normal(key, (batch, seq, hidden), dtype=jnp.float32)

    fwd = jax.jit(encoder_forward)

    out = jax.block_until_ready(fwd(x))
    assert out.shape == (batch, seq, hidden)
    assert out.dtype == x.dtype
    assert bool(jnp.allclose(out, x)), "interface pass-through mismatch"

    # Exercise the padding path (total elements not a multiple of 128).
    x_odd = jax.random.normal(key, (2, 7, 19), dtype=jnp.float32)
    out_odd = jax.block_until_ready(fwd(x_odd))
    assert out_odd.shape == x_odd.shape
    assert bool(jnp.allclose(out_odd, x_odd)), "padded pass-through mismatch"

    print("KERNEL_OK")
</pallas_src>

<mosaic_0001>
module attributes {stable_mosaic.version = 11 : i64} {
  func.func @_encoder_interface_kernel(%arg0: i32, %arg1: memref<1x512xf32, #tpu.memory_space<vmem>>, %arg2: memref<1x512xf32, #tpu.memory_space<vmem>>) attributes {dimension_semantics = [#tpu.dimension_semantics<parallel>], iteration_bounds = array<i64: 1>, scalar_prefetch = 0 : i64, scratch_operands = 0 : i64, tpu.core_type = #tpu.core_type<tc>, window_params = [{transform_indices = @transform_0, window_bounds = array<i64: 1, 512>}, {transform_indices = @transform_1, window_bounds = array<i64: 1, 512>}]} {
    %c0 = arith.constant 0 : index
    %c0_0 = arith.constant 0 : index
    %0 = vector.load %arg1[%c0, %c0_0] : memref<1x512xf32, #tpu.memory_space<vmem>>, vector<1x512xf32>
    %c0_1 = arith.constant 0 : index
    %c0_2 = arith.constant 0 : index
    %1 = vector.load %arg2[%c0_1, %c0_2] : memref<1x512xf32, #tpu.memory_space<vmem>>, vector<1x512xf32>
    tpu.vector_store %arg2[%c0_1, %c0_2], %0 {strides = array<i32>} : memref<1x512xf32, #tpu.memory_space<vmem>>, vector<1x512xf32>,
    return
  }
  func.func @transform_0(%arg0: i32) -> (i32, i32) {
    %c0_i32 = arith.constant 0 : i32
    %c0_i32_0 = arith.constant 0 : i32
    return %arg0, %c0_i32 : i32, i32
  }
  func.func @transform_1(%arg0: i32) -> (i32, i32) {
    %c0_i32 = arith.constant 0 : i32
    %c0_i32_0 = arith.constant 0 : i32
    return %arg0, %c0_i32 : i32, i32
  }
}

</mosaic_0001>

<bundles_post_ra>
// kernel: encoder_forward.1
= control target key start
LH: loop header
LB: loop body
LE: loop exit
PB: predicated region body
PF: predicated region fallthrough
CT: control target
= control target key end

     0   :  { %v9_v0 = vlaneseq  ;;  %s34_s0 = inlined_call_operand.vmem [shape: f32[1,512], index: 0, kind: input, shape index: {}, may-alias: {0,1}]   ;;  %s35_s1 = inlined_call_operand.vmem [shape: f32[1,512], index: 1, kind: output, shape index: {}, may-alias: {0,1}]  }
   0x1   :  { %v8_v1 = vld [vmem:[%s34_s0] sm:$0xf] }
   0x2   :  { %vm11_vm0 = vcmp.lt.s32.totalorder %v9_v0, 512 }
   0x3   :  { %13 = vst.msk [vmem:[%s35_s1] sm:$0xf] %vm11_vm0, %v8_v1 }

</bundles_post_ra>
